<compile_context>
chip_gen: v5e
topology: v5e:2x2
jax: 0.10.0
libtpu: 0.0.40
codegen_flags: <defaults>
</compile_context>

<pallas_src>
import jax
import jax.numpy as jnp
from jax.experimental import pallas as pl
from jax.experimental.pallas import tpu as pltpu


EPS = 0.0          # GINConv default eps (train_eps=False)
LANE = 128         # TPU lane width


def _round_up(v, m):
    return (v + m - 1) // m * m


def _vmem_capacity_bytes():
    """Physical VMEM per TensorCore; conservative fallback if query fails."""
    try:
        return int(pltpu.get_tpu_info().vmem_capacity_bytes)
    except Exception:
        return 64 * 1024 * 1024          # v7x-sized conservative fallback


# ---------------------------------------------------------------------------
# Kernels
# ---------------------------------------------------------------------------
def gin_conv_relu_kernel(a_ref, x_ref, w1_ref, b1_ref, w2_ref, b2_ref,
                         out_ref, acc_ref):
    """One GINConv (eps folded into A) + MLP + trailing ReLU (K-tiled).

    Grid: (row tiles i, source tiles k).
      a_ref:  [TM, TK]  bf16 adjacency block (diag carries 1+eps)
      x_ref:  [TK, Cp]  bf16 source node features block
      w*_ref: bf16 weights (resident), b*_ref: f32 biases [1, Hp]
      acc_ref:[TM, Cp]  f32 aggregation accumulator (VMEM scratch)
      out_ref:[TM, Hp]  bf16 (written only on the last K step)
    """
    k = pl.program_id(1)

    @pl.when(k == 0)
    def _():
        acc_ref[...] = jnp.zeros_like(acc_ref)

    # Aggregation (+ self term via the diagonal) on the MXU, f32 accumulation.
    acc_ref[...] += jnp.dot(a_ref[...], x_ref[...],
                            preferred_element_type=jnp.float32)

    @pl.when(k == pl.num_programs(1) - 1)
    def _():
        h = jnp.dot(acc_ref[...].astype(jnp.bfloat16), w1_ref[...],
                    preferred_element_type=jnp.float32) + b1_ref[...]
        h = jnp.maximum(h, 0.0)                                  # MLP ReLU (f32)
        h = jnp.dot(h.astype(jnp.bfloat16), w2_ref[...],
                    preferred_element_type=jnp.float32) + b2_ref[...]
        # Post-conv F.relu (dropout is identity in eval mode).
        out_ref[...] = jnp.maximum(h, 0.0).astype(out_ref.dtype)


def gin_conv_relu_head_kernel(a_ref, x_ref, w3_ref, b3_ref, w4_ref, b4_ref,
                              w5_ref, b5_ref, out_ref, acc_ref):
    """Second GINConv + MLP + ReLU + Linear head (same K-tiled scheme)."""
    k = pl.program_id(1)

    @pl.when(k == 0)
    def _():
        acc_ref[...] = jnp.zeros_like(acc_ref)

    acc_ref[...] += jnp.dot(a_ref[...], x_ref[...],
                            preferred_element_type=jnp.float32)

    @pl.when(k == pl.num_programs(1) - 1)
    def _():
        h = jnp.dot(acc_ref[...].astype(jnp.bfloat16), w3_ref[...],
                    preferred_element_type=jnp.float32) + b3_ref[...]
        h = jnp.maximum(h, 0.0)
        h = jnp.dot(h.astype(jnp.bfloat16), w4_ref[...],
                    preferred_element_type=jnp.float32) + b4_ref[...]
        x2 = jnp.maximum(h, 0.0)                                 # post-conv ReLU
        out_ref[...] = (jnp.dot(x2.astype(jnp.bfloat16), w5_ref[...],
                                preferred_element_type=jnp.float32) + b5_ref[...])


# ---------------------------------------------------------------------------
# Tiling / wrapper
# ---------------------------------------------------------------------------
def _tile_sizes(n, tm_base):
    """Pick (tm, tk, n_pad): n_pad % tm == 0, n_pad % tk == 0, tm % 16 == 0
    (bf16 sublane packing), tk a multiple of 128 or the full dim, and an even
    (>=2) row-tile count for mid/large graphs so v7x megacore stays balanced."""
    if n <= 128:
        tm = _round_up(max(n, 16), 16)
        return tm, tm, tm                       # single row tile, single K tile
    if n <= 512:
        n_pad = _round_up(n, 32)
        return n_pad // 2, n_pad, n_pad         # 2 row tiles, single K tile
    tk = 512                                    # K (source-node) tile
    n_pad = _round_up(n, 512)
    tm = min(tm_base, n_pad)
    return tm, tk, n_pad


def gin_model_forward(x, edge_index, params, eps=EPS):
    """x: [N, Cin] float32, edge_index: [2, E] int32 (row 0 = src, row 1 = dst)."""
    n, cin = x.shape
    e = edge_index.shape[1]
    hidden = params["w1"].shape[1]
    out_channels = params["w5"].shape[1]

    # ---- generation-aware sizing -------------------------------------------
    vmem_cap = _vmem_capacity_bytes()
    if vmem_cap >= 96 * 1024 * 1024:            # v5e / v6e: 128 MiB physical
        vmem_limit = 100 * 1024 * 1024
        tm_base = 512
    else:                                       # v7x: 64 MiB per TensorCore
        vmem_limit = 48 * 1024 * 1024
        tm_base = 256

    cp = _round_up(cin, LANE)
    hp = _round_up(hidden, LANE)
    op = _round_up(out_channels, LANE)
    tm, tk, n_pad = _tile_sizes(n, tm_base)
    grid = (n_pad // tm, n_pad // tk)

    # ---- dense adjacency: ONE scatter into a padded bf16 buffer, with the
    #      GIN (1+eps) self term appended as self-loop entries ----------------
    idx_dtype = edge_index.dtype
    diag = jnp.arange(n, dtype=idx_dtype)
    all_src = jnp.concatenate([edge_index[0], diag])
    all_dst = jnp.concatenate([edge_index[1], diag])
    vals = jnp.concatenate([jnp.ones((e,), jnp.bfloat16),
                            jnp.full((n,), 1.0 + eps, jnp.bfloat16)])
    adj = jnp.zeros((n_pad, n_pad), jnp.bfloat16).at[all_dst, all_src].add(vals)

    xp = jnp.pad(x, ((0, n_pad - n), (0, cp - cin))).astype(jnp.bfloat16)

    def pad_w(w):   # zero-pad to lane-dense [in_pad, out_pad], cast bf16
        return jnp.pad(
            w, ((0, _round_up(w.shape[0], LANE) - w.shape[0]),
                (0, _round_up(w.shape[1], LANE) - w.shape[1]))).astype(jnp.bfloat16)

    def pad_b(b):   # biases stay f32 (elementwise math stays f32)
        return jnp.pad(
            b, ((0, 0), (0, _round_up(b.shape[1], LANE) - b.shape[1]))).astype(jnp.float32)

    w1, b1 = pad_w(params["w1"]), pad_b(params["b1"])
    w2, b2 = pad_w(params["w2"]), pad_b(params["b2"])
    w3, b3 = pad_w(params["w3"]), pad_b(params["b3"])
    w4, b4 = pad_w(params["w4"]), pad_b(params["b4"])
    w5, b5 = pad_w(params["w5"]), pad_b(params["b5"])

    a_spec = pl.BlockSpec((tm, tk), lambda i, k: (i, k))          # K-tiled A
    x_spec = lambda c: pl.BlockSpec((tk, c), lambda i, k: (k, 0))  # K-tiled x
    res = lambda shape: pl.BlockSpec(shape, lambda i, k: (0, 0))   # resident
    out_spec = lambda c: pl.BlockSpec((tm, c), lambda i, k: (i, 0))

    cparams = pltpu.CompilerParams(
        dimension_semantics=("parallel", "arbitrary"),  # rows across TCs, K reduce
        vmem_limit_bytes=vmem_limit,
    )

    # ---- layer 1: GINConv + ReLU -------------------------------------------
    cost1 = pl.CostEstimate(
        flops=2 * (n_pad * n_pad * cp + n_pad * cp * hp + n_pad * hp * hp),
        transcendentals=0,
        bytes_accessed=(n_pad * n_pad * 2 + n_pad * cp * 2
                        + (cp * hp + hp * hp) * 2 + 2 * hp * 4
                        + n_pad * hp * 2),
    )
    x1 = pl.pallas_call(
        gin_conv_relu_kernel,
        out_shape=jax.ShapeDtypeStruct((n_pad, hp), jnp.bfloat16),
        grid=grid,
        in_specs=[a_spec, x_spec(cp),
                  res((cp, hp)), res((1, hp)),
                  res((hp, hp)), res((1, hp))],
        out_specs=out_spec(hp),
        scratch_shapes=[pltpu.VMEM((tm, cp), jnp.float32)],
        compiler_params=cparams,
        cost_estimate=cost1,
    )(adj, xp, w1, b1, w2, b2)

    # ---- layer 2: GINConv + ReLU + Linear head ------------------------------
    cost2 = pl.CostEstimate(
        flops=2 * (n_pad * n_pad * hp + 2 * n_pad * hp * hp + n_pad * hp * op),
        transcendentals=0,
        bytes_accessed=(n_pad * n_pad * 2 + n_pad * hp * 2
                        + (2 * hp * hp + hp * op) * 2
                        + (2 * hp + op) * 4 + n_pad * op * 4),
    )
    out_pad = pl.pallas_call(
        gin_conv_relu_head_kernel,
        out_shape=jax.ShapeDtypeStruct((n_pad, op), jnp.float32),
        grid=grid,
        in_specs=[a_spec, x_spec(hp),
                  res((hp, hp)), res((1, hp)),
                  res((hp, hp)), res((1, hp)),
                  res((hp, op)), res((1, op))],
        out_specs=out_spec(op),
        scratch_shapes=[pltpu.VMEM((tm, hp), jnp.float32)],
        compiler_params=cparams,
        cost_estimate=cost2,
    )(adj, x1, w3, b3, w4, b4, w5, b5)

    # Strip node / channel padding.  (Padded rows of x1 are non-zero after the
    # biased MLP, but A's padded columns are zero, so they never contaminate.)
    return out_pad[:n, :out_channels]


# ---------------------------------------------------------------------------
# Pure-JAX f32 reference (same math, no padding / bf16) for validation.
# ---------------------------------------------------------------------------
def gin_reference(x, edge_index, params, eps=EPS):
    src, dst = edge_index[0], edge_index[1]

    def aggregate(h):
        msg = jnp.zeros_like(h).at[dst].add(h[src])
        return (1.0 + eps) * h + msg

    h = aggregate(x)
    h = jnp.maximum(h @ params["w1"] + params["b1"], 0.0)
    x1 = jnp.maximum(h @ params["w2"] + params["b2"], 0.0)
    h = aggregate(x1)
    h = jnp.maximum(h @ params["w3"] + params["b3"], 0.0)
    x2 = jnp.maximum(h @ params["w4"] + params["b4"], 0.0)
    return x2 @ params["w5"] + params["b5"]


# ---------------------------------------------------------------------------
# Parameter init (PyTorch-style uniform(-1/sqrt(fan_in), 1/sqrt(fan_in)))
# Weights are stored [in, out] so the kernel does x @ W.
# ---------------------------------------------------------------------------
def init_params(key, in_channels, hidden_channels, out_channels):
    def linear(k, fan_in, fan_out):
        kw, kb = jax.random.split(k)
        bound = 1.0 / jnp.sqrt(jnp.float32(fan_in))
        w = jax.random.uniform(kw, (fan_in, fan_out), jnp.float32, -bound, bound)
        b = jax.random.uniform(kb, (1, fan_out), jnp.float32, -bound, bound)
        return w, b

    keys = jax.random.split(key, 5)
    w1, b1 = linear(keys[0], in_channels, hidden_channels)
    w2, b2 = linear(keys[1], hidden_channels, hidden_channels)
    w3, b3 = linear(keys[2], hidden_channels, hidden_channels)
    w4, b4 = linear(keys[3], hidden_channels, hidden_channels)
    w5, b5 = linear(keys[4], hidden_channels, out_channels)
    return dict(w1=w1, b1=b1, w2=w2, b2=b2, w3=w3, b3=b3,
                w4=w4, b4=b4, w5=w5, b5=b5)


if __name__ == "__main__":
    key = jax.random.PRNGKey(0)
    k_x, k_e, k_p = jax.random.split(key, 3)

    num_nodes = 32
    num_edges = 64
    in_channels = 16
    hidden_channels = 32
    out_channels = 8

    x = jax.random.normal(k_x, (num_nodes, in_channels), dtype=jnp.float32)
    edge_index = jax.random.randint(k_e, (2, num_edges), 0, num_nodes, dtype=jnp.int32)
    params = init_params(k_p, in_channels, hidden_channels, out_channels)

    logits = jax.block_until_ready(gin_model_forward(x, edge_index, params))
    assert logits.shape == (num_nodes, out_channels)
    assert bool(jnp.all(jnp.isfinite(logits)))

    # Loose tolerance vs an f32 reference (bf16 operands introduce ~1e-2 drift).
    ref = gin_reference(x, edge_index, params)
    max_err = float(jnp.max(jnp.abs(logits - ref)))
    assert max_err < 0.25, f"max abs error vs reference: {max_err}"

    print("KERNEL_OK")
</pallas_src>

<mosaic_0001>
module attributes {stable_mosaic.version = 11 : i64} {
  func.func @gin_conv_relu_kernel(%arg0: i32, %arg1: i32, %arg2: memref<32x32xbf16, #tpu.memory_space<vmem>>, %arg3: memref<32x128xbf16, #tpu.memory_space<vmem>>, %arg4: memref<128x128xbf16, #tpu.memory_space<vmem>>, %arg5: memref<1x128xf32, #tpu.memory_space<vmem>>, %arg6: memref<128x128xbf16, #tpu.memory_space<vmem>>, %arg7: memref<1x128xf32, #tpu.memory_space<vmem>>, %arg8: memref<32x128xbf16, #tpu.memory_space<vmem>>, %arg9: memref<32x128xf32, #tpu.memory_space<vmem>>) attributes {dimension_semantics = [#tpu.dimension_semantics<parallel>, #tpu.dimension_semantics<arbitrary>], iteration_bounds = array<i64: 1, 1>, scalar_prefetch = 0 : i64, scratch_operands = 1 : i64, tpu.core_type = #tpu.core_type<tc>, window_params = [{transform_indices = @transform_0, window_bounds = array<i64: 32, 32>}, {transform_indices = @transform_1, window_bounds = array<i64: 32, 128>}, {pipeline_mode = #tpu.pipeline_mode<synchronous>, transform_indices = @transform_2, window_bounds = array<i64: 128, 128>}, {pipeline_mode = #tpu.pipeline_mode<synchronous>, transform_indices = @transform_3, window_bounds = array<i64: 1, 128>}, {pipeline_mode = #tpu.pipeline_mode<synchronous>, transform_indices = @transform_4, window_bounds = array<i64: 128, 128>}, {pipeline_mode = #tpu.pipeline_mode<synchronous>, transform_indices = @transform_5, window_bounds = array<i64: 1, 128>}, {transform_indices = @transform_6, window_bounds = array<i64: 32, 128>}]} {
    %c0_i32 = arith.constant 0 : i32
    %0 = arith.cmpi eq, %arg1, %c0_i32 : i32
    %1 = arith.extui %0 : i1 to i32
    %c0_i32_0 = arith.constant 0 : i32
    %2 = arith.cmpi ne, %1, %c0_i32_0 : i32
    scf.if %2 {
      %cst_10 = arith.constant 0.000000e+00 : f32
      %12 = vector.broadcast %cst_10 : f32 to vector<32x128xf32>
      %c0_11 = arith.constant 0 : index
      %c0_12 = arith.constant 0 : index
      %13 = vector.load %arg9[%c0_11, %c0_12] : memref<32x128xf32, #tpu.memory_space<vmem>>, vector<32x128xf32>
      tpu.vector_store %arg9[%c0_11, %c0_12], %12 {strides = array<i32>} : memref<32x128xf32, #tpu.memory_space<vmem>>, vector<32x128xf32>,
    } else {
    }
    %c0 = arith.constant 0 : index
    %c0_1 = arith.constant 0 : index
    %3 = vector.load %arg9[%c0, %c0_1] : memref<32x128xf32, #tpu.memory_space<vmem>>, vector<32x128xf32>
    %c0_2 = arith.constant 0 : index
    %c0_3 = arith.constant 0 : index
    %4 = vector.load %arg2[%c0_2, %c0_3] : memref<32x32xbf16, #tpu.memory_space<vmem>>, vector<32x32xbf16>
    %c0_4 = arith.constant 0 : index
    %c0_5 = arith.constant 0 : index
    %5 = vector.load %arg3[%c0_4, %c0_5] : memref<32x128xbf16, #tpu.memory_space<vmem>>, vector<32x128xbf16>
    %cst = arith.constant dense<0.000000e+00> : vector<32x128xf32>
    %6 = tpu.matmul %4, %5, %cst {dimension_numbers = #tpu.dot_dimension_numbers<[1], [0], [0], [1], [0, 0, 1, 1], [], []>} : vector<32x32xbf16>, vector<32x128xbf16>, vector<32x128xf32> -> vector<32x128xf32>
    %7 = arith.addf %3, %6 : vector<32x128xf32>
    %c0_6 = arith.constant 0 : index
    %c0_7 = arith.constant 0 : index
    %8 = vector.load %arg9[%c0_6, %c0_7] : memref<32x128xf32, #tpu.memory_space<vmem>>, vector<32x128xf32>
    tpu.vector_store %arg9[%c0_6, %c0_7], %7 {strides = array<i32>} : memref<32x128xf32, #tpu.memory_space<vmem>>, vector<32x128xf32>,
    %c0_i32_8 = arith.constant 0 : i32
    %9 = arith.cmpi eq, %arg1, %c0_i32_8 : i32
    %10 = arith.extui %9 : i1 to i32
    %c0_i32_9 = arith.constant 0 : i32
    %11 = arith.cmpi ne, %10, %c0_i32_9 : i32
    scf.if %11 {
      %c0_10 = arith.constant 0 : index
      %c0_11 = arith.constant 0 : index
      %12 = vector.load %arg9[%c0_10, %c0_11] : memref<32x128xf32, #tpu.memory_space<vmem>>, vector<32x128xf32>
      %13 = arith.truncf %12 : vector<32x128xf32> to vector<32x128xbf16>
      %c0_12 = arith.constant 0 : index
      %c0_13 = arith.constant 0 : index
      %14 = vector.load %arg4[%c0_12, %c0_13] : memref<128x128xbf16, #tpu.memory_space<vmem>>, vector<128x128xbf16>
      %cst_14 = arith.constant dense<0.000000e+00> : vector<32x128xf32>
      %15 = tpu.matmul %13, %14, %cst_14 {dimension_numbers = #tpu.dot_dimension_numbers<[1], [0], [0], [1], [0, 0, 1, 1], [], []>} : vector<32x128xbf16>, vector<128x128xbf16>, vector<32x128xf32> -> vector<32x128xf32>
      %c0_15 = arith.constant 0 : index
      %c0_16 = arith.constant 0 : index
      %16 = vector.load %arg5[%c0_15, %c0_16] : memref<1x128xf32, #tpu.memory_space<vmem>>, vector<1x128xf32>
      %17 = vector.broadcast %16 : vector<1x128xf32> to vector<32x128xf32>
      %18 = arith.addf %15, %17 : vector<32x128xf32>
      %cst_17 = arith.constant 0.000000e+00 : f32
      %19 = vector.broadcast %cst_17 : f32 to vector<32x128xf32>
      %20 = arith.maximumf %18, %19 : vector<32x128xf32>
      %21 = arith.truncf %20 : vector<32x128xf32> to vector<32x128xbf16>
      %c0_18 = arith.constant 0 : index
      %c0_19 = arith.constant 0 : index
      %22 = vector.load %arg6[%c0_18, %c0_19] : memref<128x128xbf16, #tpu.memory_space<vmem>>, vector<128x128xbf16>
      %cst_20 = arith.constant dense<0.000000e+00> : vector<32x128xf32>
      %23 = tpu.matmul %21, %22, %cst_20 {dimension_numbers = #tpu.dot_dimension_numbers<[1], [0], [0], [1], [0, 0, 1, 1], [], []>} : vector<32x128xbf16>, vector<128x128xbf16>, vector<32x128xf32> -> vector<32x128xf32>
      %c0_21 = arith.constant 0 : index
      %c0_22 = arith.constant 0 : index
      %24 = vector.load %arg7[%c0_21, %c0_22] : memref<1x128xf32, #tpu.memory_space<vmem>>, vector<1x128xf32>
      %25 = vector.broadcast %24 : vector<1x128xf32> to vector<32x128xf32>
      %26 = arith.addf %23, %25 : vector<32x128xf32>
      %cst_23 = arith.constant 0.000000e+00 : f32
      %27 = vector.broadcast %cst_23 : f32 to vector<32x128xf32>
      %28 = arith.maximumf %26, %27 : vector<32x128xf32>
      %29 = arith.truncf %28 : vector<32x128xf32> to vector<32x128xbf16>
      %c0_24 = arith.constant 0 : index
      %c0_25 = arith.constant 0 : index
      %30 = vector.load %arg8[%c0_24, %c0_25] : memref<32x128xbf16, #tpu.memory_space<vmem>>, vector<32x128xbf16>
      tpu.vector_store %arg8[%c0_24, %c0_25], %29 {strides = array<i32>} : memref<32x128xbf16, #tpu.memory_space<vmem>>, vector<32x128xbf16>,
    } else {
    }
    return
  }
  func.func @transform_0(%arg0: i32, %arg1: i32) -> (i32, i32) {
    %c0_i32 = arith.constant 0 : i32
    return %arg0, %arg1 : i32, i32
  }
  func.func @transform_1(%arg0: i32, %arg1: i32) -> (i32, i32) {
    %c0_i32 = arith.constant 0 : i32
    %c0_i32_0 = arith.constant 0 : i32
    return %arg1, %c0_i32 : i32, i32
  }
  func.func @transform_2(%arg0: i32, %arg1: i32) -> (i32, i32) {
    %c0_i32 = arith.constant 0 : i32
    %c0_i32_0 = arith.constant 0 : i32
    %c0_i32_1 = arith.constant 0 : i32
    return %c0_i32, %c0_i32_0 : i32, i32
  }
  func.func @transform_3(%arg0: i32, %arg1: i32) -> (i32, i32) {
    %c0_i32 = arith.constant 0 : i32
    %c0_i32_0 = arith.constant 0 : i32
    %c0_i32_1 = arith.constant 0 : i32
    return %c0_i32, %c0_i32_0 : i32, i32
  }
  func.func @transform_4(%arg0: i32, %arg1: i32) -> (i32, i32) {
    %c0_i32 = arith.constant 0 : i32
    %c0_i32_0 = arith.constant 0 : i32
    %c0_i32_1 = arith.constant 0 : i32
    return %c0_i32, %c0_i32_0 : i32, i32
  }
  func.func @transform_5(%arg0: i32, %arg1: i32) -> (i32, i32) {
    %c0_i32 = arith.constant 0 : i32
    %c0_i32_0 = arith.constant 0 : i32
    %c0_i32_1 = arith.constant 0 : i32
    return %c0_i32, %c0_i32_0 : i32, i32
  }
  func.func @transform_6(%arg0: i32, %arg1: i32) -> (i32, i32) {
    %c0_i32 = arith.constant 0 : i32
    %c0_i32_0 = arith.constant 0 : i32
    return %arg0, %c0_i32 : i32, i32
  }
}

</mosaic_0001>

<bundles_post_ra>
// kernel: tpu_custom_call.1
= control target key start
LH: loop header
LB: loop body
LE: loop exit
PB: predicated region body
PF: predicated region fallthrough
CT: control target
= control target key end

     0   :  { %11 = vsyncpa [#allocation4], 0  ;;  %s730_s0 = inlined_call_operand.hbm [shape: bf16[32,32], index: 0, kind: input, shape index: {}]   ;;  %s731_s1 = inlined_call_operand.hbm [shape: bf16[32,128], index: 1, kind: input, shape index: {}]   ;;  %s732_s2 = inlined_call_operand.hbm [shape: bf16[128,128], index: 2, kind: input, shape index: {}]   ;;  %s733_s3 = inlined_call_operand.vmem [shape: f32[1,128], index: 3, kind: input, shape index: {}]   ;;  %s734_s4 = inlined_call_operand.hbm [shape: bf16[128,128], index: 4, kind: input, shape index: {}]   ;;  %s735_s5 = inlined_call_operand.vmem [shape: f32[1,128], index: 5, kind: input, shape index: {}]   ;;  %s736_s6 = inlined_call_operand.hbm [shape: bf16[32,128], index: 6, kind: output, shape index: {}]  }
   0x1   :  { %12 = vsyncpa [#allocation7], 0 }
   0x2   :  { %13 = vsyncpa [#allocation10], 0 }
   0x3   :  { %14 = vsyncpa [#allocation5], 0  ;;  %s32_s23 = sshll.u32 %s731_s1, 4  ;;  %s652_s24 = smov [#allocation6]   ;;  %s33_s23 = int_to_ptr.hbm [resolvable:$true] %s32_s23 }
   0x4   :  { %s34_s25 = sshll.u32 %s652_s24, 4  ;;  %s19_s28 = sshll.u32 %s730_s0, 4  ;;  %s35_s25 = int_to_ptr.vmem [resolvable:$true] %s34_s25  ;;  %s20_s28 = int_to_ptr.hbm [resolvable:$true] %s19_s28 }
   0x5   :  { %s653_s29 = smov 64   ;;  %s654_s30 = smov 4  }
   0x6   :  { %40 = dma.hbm_to_vmem [thread:$0]  %s33_s23, 256, %s35_s25, [#allocation7], %s653_s29, %s653_s29, %s654_s30  }
   0x7   :  { %s655_s7 = smov [#allocation3]   ;;  %s45_s1 = sshll.u32 %s732_s2, 4  ;;  %s46_s1 = int_to_ptr.hbm [resolvable:$true] %s45_s1 }
   0x8   :  { %s21_s8 = sshll.u32 %s655_s7, 4  ;;  %s60_s12 = sshll.u32 %s734_s4, 4  ;;  %s22_s8 = int_to_ptr.vmem [resolvable:$true] %s21_s8  ;;  %s61_s12 = int_to_ptr.hbm [resolvable:$true] %s60_s12 }
   0x9   :  { %27 = dma.hbm_to_vmem [thread:$0]  %s20_s28, 256, %s22_s8, [#allocation4], %s653_s29, %s653_s29, %s654_s30  }
   0xa   :  { %s656_s13 = smov [#allocation8]   ;;  %s657_s15 = smov [#allocation9]  }
   0xb   :  { %s47_s14 = sshll.u32 %s656_s13, 4  ;;  %s62_s2 = sshll.u32 %s657_s15, 4  ;;  %s48_s14 = int_to_ptr.vmem [resolvable:$true] %s47_s14  ;;  %s63_s2 = int_to_ptr.vmem [resolvable:$true] %s62_s2 }
   0xc   :  { %53 = dma.hbm_to_vmem [thread:$0]  %s46_s1, 1024, %s48_s14, [#allocation7], %s653_s29, %s653_s29, %s654_s30  }
   0xd   :  { %68 = dma.hbm_to_vmem [thread:$0]  %s61_s12, 1024, %s63_s2, [#allocation10], %s653_s29, %s653_s29, %s654_s30  }
   0xe   :  { %644 = dma.done.wait [#allocation4], 256  }
   0xf   :  { %645 = vsyncadd [#allocation4], 4294967040 }
  0x10   :  { %646 = dma.done.wait [#allocation7], 1280  }
  0x11   :  { %647 = vsyncadd [#allocation7], 4294966016 }
  0x12   :  { %648 = dma.done.wait [#allocation10], 1024  }
  0x13   :  { %649 = vsyncadd [#allocation10], 4294966272  ;;  %v471_v0 = vld [vmem:[#allocation6 + $0x8] sm:$0xff]  ;;  %v470_v2 = vld [vmem:[#allocation6] sm:$0xff]  ;;  %vm130_vm0 = vcmask 261120   ;;  %s371_s22 = sshll.u32 %s736_s6, 4  ;;  %s372_s22 = int_to_ptr.hbm [resolvable:$true] %s371_s22 }
  0x14   :  { %v479_v1 = vld [vmem:[#allocation8 + $0x38] sm:$0xff]  ;;  %143 = vmatpush.bf16.msra.mxu0 %v471_v0  ;;  %v478_v3 = vld [vmem:[#allocation8 + $0x30] sm:$0xff]  ;;  %v468_v4 = vld [vmem:[#allocation3] sm:$0xff] }
  0x15   :  { %241 = vmatpush.bf16.msra.mxu1 %v479_v1  ;;  %499 = vmatpush.bf16.msra.mxu3 %v479_v1  ;;  %v477_v5 = vld [vmem:[#allocation8 + $0x28] sm:$0xff]  ;;  %v476_v6 = vld [vmem:[#allocation8 + $0x20] sm:$0xff]  ;;  %v475_v7 = vld [vmem:[#allocation8 + $0x18] sm:$0xff] }
  0x16   :  { %v469_v8 = vld [vmem:[#allocation3 + $0x8] sm:$0xff]  ;;  %v474_v9 = vld [vmem:[#allocation8 + $0x10] sm:$0xff]  ;;  %v472_v11 = vld [vmem:[#allocation8] sm:$0xff] }
  0x17   :  { %v473_v10 = vld [vmem:[#allocation8 + $0x8] sm:$0xff]  ;;  %v487_v12 = vld [vmem:[#allocation9 + $0x38] sm:$0xff]  ;;  %v486_v13 = vld [vmem:[#allocation9 + $0x30] sm:$0xff] }
  0x18   :  { %144 = vmatpush.bf16.msra.mxu0 %v470_v2  ;;  %507 = vmatpush.bf16.msra.mxu2 %v487_v12  ;;  %v485_v15 = vld [vmem:[#allocation9 + $0x28] sm:$0xff]  ;;  %v484_v16 = vld [vmem:[#allocation9 + $0x20] sm:$0xff]  ;;  %v483_v22 = vld [vmem:[#allocation9 + $0x18] sm:$0xff] }
  0x19   :  { %242 = vmatpush.bf16.msra.mxu1 %v478_v3  ;;  %500 = vmatpush.bf16.msra.mxu3 %v478_v3  ;;  %v482_v23 = vld [vmem:[#allocation9 + $0x10] sm:$0xff]  ;;  %v481_v24 = vld [vmem:[#allocation9 + $0x8] sm:$0xff]  ;;  %v480_v25 = vld [vmem:[#allocation9] sm:$0xff] }
  0x1a   :  { %v522_v27 = vld [vmem:[%s733_s3] ss:$0 sm:$0xff]  ;;  %s658_s3 = smov [#allocation11]  }
  0x1b   :  { %402 = vmatmul.msk.bf16.vlgmr.msra.gmra.mxu0 %vm130_vm0, %v468_v4  ;;  %v523_v42 = vld [vmem:[%s735_s5] ss:$0 sm:$0xff]  ;;  %s369_s19 = sshll.u32 %s658_s3, 4  ;;  %s370_s19 = int_to_ptr.vmem [resolvable:$true] %s369_s19 }
  0x1c   :  { %334 = vmatpush.bf16.msrb.mxu0 %v487_v12  ;;  %508 = vmatpush.bf16.msra.mxu2 %v486_v13 }
  0x1d   :  { %243 = vmatpush.bf16.msra.mxu1 %v477_v5  ;;  %501 = vmatpush.bf16.msra.mxu3 %v477_v5 }
  0x20   :  { %335 = vmatpush.bf16.msrb.mxu0 %v486_v13  ;;  %509 = vmatpush.bf16.msra.mxu2 %v485_v15 }
  0x21   :  { %244 = vmatpush.bf16.msra.mxu1 %v476_v6  ;;  %502 = vmatpush.bf16.msra.mxu3 %v476_v6 }
  0x24   :  { %336 = vmatpush.bf16.msrb.mxu0 %v485_v15  ;;  %510 = vmatpush.bf16.msra.mxu2 %v484_v16 }
  0x25   :  { %245 = vmatpush.bf16.msra.mxu1 %v475_v7  ;;  %503 = vmatpush.bf16.msra.mxu3 %v475_v7 }
  0x28   :  { %337 = vmatpush.bf16.msrb.mxu0 %v484_v16  ;;  %511 = vmatpush.bf16.msra.mxu2 %v483_v22 }
  0x29   :  { %246 = vmatpush.bf16.msra.mxu1 %v474_v9  ;;  %504 = vmatpush.bf16.msra.mxu3 %v474_v9 }
  0x2b   :  { %403 = vmatmul.msk.bf16.gmra.mxu0 %vm130_vm0, %v469_v8 }
  0x2c   :  { %338 = vmatpush.bf16.msrb.mxu0 %v483_v22  ;;  %512 = vmatpush.bf16.msra.mxu2 %v482_v23 }
  0x2d   :  { %247 = vmatpush.bf16.msra.mxu1 %v473_v10  ;;  %505 = vmatpush.bf16.msra.mxu3 %v473_v10 }
  0x30   :  { %339 = vmatpush.bf16.msrb.mxu0 %v482_v23  ;;  %513 = vmatpush.bf16.msra.mxu2 %v481_v24 }
  0x31   :  { %248 = vmatpush.bf16.msra.mxu1 %v472_v11  ;;  %506 = vmatpush.bf16.msra.mxu3 %v472_v11 }
  0x34   :  { %340 = vmatpush.bf16.msrb.mxu0 %v481_v24  ;;  %514 = vmatpush.bf16.msra.mxu2 %v480_v25 }
  0x38   :  { %341 = vmatpush.bf16.msrb.mxu0 %v480_v25 }
  0x98   :  { %v146_v14 = vpop.f32.mrf.mxu0 }
  0xa0   :  { %v148_v17 = vpop.f32.mrf.mxu0 }
  0xa1   :  { %v171_v18 = vpack.c.bf16 %v148_v17, %v146_v14 }
  0xa3   :  { %249 = vmatmul.bf16.vlgmr.msra.gmra.mxu1 %v171_v18 }
  0xa8   :  { %v151_v19 = vpop.f32.mrf.mxu0 }
  0xb0   :  { %v153_v20 = vpop.f32.mrf.mxu0 }
  0xb1   :  { %v172_v21 = vpack.c.bf16 %v153_v20, %v151_v19 }
  0xb3   :  { %254 = vmatmul.bf16.vlgmr.msra.gmra.mxu3 %v172_v21 }
 0x120   :  { %v250_v26 = vpop.f32.mrf.mxu1 }
 0x121   :  { %v251_v28 = vadd.f32 %v522_v27, %v250_v26 }
 0x123   :  { %v260_v31 = vmax.f32 %v251_v28, 0.0 }
 0x128   :  { %v252_v29 = vpop.f32.mrf.mxu1 }
 0x129   :  { %v253_v30 = vadd.f32 %v522_v27, %v252_v29 }
 0x12b   :  { %v261_v32 = vmax.f32 %v253_v30, 0.0 }
 0x12d   :  { %v264_v33 = vpack.c.bf16 %v261_v32, %v260_v31 }
 0x12f   :  { %342 = vmatmul.bf16.vlgmr.msrb.gmra.mxu0 %v264_v33 }
 0x136   :  { %v255_v34 = vpop.f32.mrf.mxu3 }
 0x137   :  { %v256_v35 = vadd.f32 %v522_v27, %v255_v34 }
 0x139   :  { %v262_v38 = vmax.f32 %v256_v35, 0.0 }
 0x13e   :  { %v257_v36 = vpop.f32.mrf.mxu3 }
 0x13f   :  { %v258_v37 = vadd.f32 %v522_v27, %v257_v36 }
 0x141   :  { %v263_v39 = vmax.f32 %v258_v37, 0.0 }
 0x143   :  { %v265_v40 = vpack.c.bf16 %v263_v39, %v262_v38 }
 0x145   :  { %347 = vmatmul.bf16.vlgmr.msra.gmra.mxu2 %v265_v40 }
 0x1ac   :  { %v343_v41 = vpop.f32.mrf.mxu0 }
 0x1ad   :  { %v344_v43 = vadd.f32 %v523_v42, %v343_v41 }
 0x1af   :  { %v353_v46 = vmax.f32 %v344_v43, 0.0 }
 0x1b4   :  { %v345_v44 = vpop.f32.mrf.mxu0 }
 0x1b5   :  { %v346_v45 = vadd.f32 %v523_v42, %v345_v44 }
 0x1b7   :  { %v354_v47 = vmax.f32 %v346_v45, 0.0 }
 0x1b9   :  { %v491_v48 = vpack.c.bf16 %v354_v47, %v353_v46 }
 0x1bb   :  { %492 = vst [vmem:[#allocation11] sm:$0xff] %v491_v48  }
 0x1c8   :  { %v348_v49 = vpop.f32.mrf.mxu2 }
 0x1c9   :  { %v349_v50 = vadd.f32 %v523_v42, %v348_v49 }
 0x1cb   :  { %v355_v53 = vmax.f32 %v349_v50, 0.0 }
 0x1d0   :  { %v350_v51 = vpop.f32.mrf.mxu2 }
 0x1d1   :  { %v351_v52 = vadd.f32 %v523_v42, %v350_v51 }
 0x1d3   :  { %v356_v54 = vmax.f32 %v351_v52, 0.0 }
 0x1d5   :  { %v496_v55 = vpack.c.bf16 %v356_v54, %v355_v53 }
 0x1d7   :  { %498 = vst [vmem:[#allocation11 + $0x8] sm:$0xff] %v496_v55  }
 0x1d8   :  { %377 = dma.vmem_to_hbm [thread:$0]  %s370_s19, 256, %s372_s22, [#allocation5], %s653_s29, %s653_s29, %s654_s30  }
 0x1d9   :  { %650 = dma.done.wait [#allocation5], 256  }
 0x1da   :  { %651 = vsyncadd [#allocation5], 4294967040 }
 0x1db   :  { %382 = vsyncpa [#allocation4], 1 }
 0x1dc   :  { %383 = vsyncpa [#allocation7], 1 }
 0x1dd   :  { %384 = vsyncpa [#allocation10], 1 }
 0x1de   :  { %385 = vsyncpa [#allocation5], 1 }

</bundles_post_ra>
